<compile_context>
chip_gen: v7x
topology: tpu7x:2x2x1
jax: 0.10.0
libtpu: 0.0.40
codegen_flags: <defaults>
</compile_context>

<pallas_src>
import functools
import math

import jax
import jax.numpy as jnp
from jax import lax
from jax.experimental import pallas as pl
from jax.experimental.pallas import tpu as pltpu

_SQRT_HALF = math.sqrt(0.5)
_LANE = 128
_SUB = 16          # sublane granularity that is packed-tile aligned for f32 & bf16


def _round_up(n, m):
    return (n + m - 1) // m * m


def _cdiv(a, b):
    return -(-a // b)


def _pad_axis(a, target, axis):
    pad = target - a.shape[axis]
    if pad == 0:
        return a
    widths = [(0, 0)] * a.ndim
    widths[axis] = (0, pad)
    return jnp.pad(a, widths)


def _choose_tile_l(requested, L, B, dilation):
    # Keep the per-tile halo (2*d8 rows) a small fraction of the tile.
    requested = max(requested, 4 * dilation)
    # Smallest tile that still contains a full dilation halo on each side.
    min_tile = _round_up(max(dilation + 1, _SUB), _SUB)
    t = max(min_tile, min(_round_up(requested, _SUB), _round_up(L, _SUB)))
    # v7x megacore (2 TCs): with B == 1 make sure the time grid has >= 2
    # parallel steps so both cores get work.
    if B == 1 and _cdiv(L, t) < 2 and _cdiv(L, 2) >= min_tile:
        t = _round_up(_cdiv(L, 2), _SUB)
    # Large tiles: multiples of 256 -> full MXU row passes on v6e/v7x.
    if t >= 256:
        t = _round_up(t, 256)
    return t


def _residual_block_kernel(x_ref, halo_ref, pvec_ref,
                           w_dil_ref, w_rs_ref, b_rs_ref,
                           out_ref, skip_ref, x_ext_ref,
                           *, dilation, seq_len, tile_l, c_pad, d8):
    l = pl.program_id(1)

    x_t = x_ref[0]                          # (tile_l, c_pad)  compute dtype
    halo = halo_ref[0, 0]                   # (2*d8, c_pad)    compute dtype
    pv = pvec_ref[0]                        # (8, 2*c_pad)     f32

    # Assemble the halo-extended tile in VMEM scratch (aligned static stores):
    # row j of x_ext <-> time index tile_start - d8 + j, zero outside [0, L).
    x_ext_ref[:d8, :] = halo[:d8]
    x_ext_ref[d8:d8 + tile_l, :] = x_t
    x_ext_ref[d8 + tile_l:, :] = halo[d8:]

    # Dilated Conv1d(C -> 2C, k=3, 'same'): three shifted windows of the
    # extended tile, one matmul per tap, f32 accumulation on the MXU.
    x_lo = x_ext_ref[d8 - dilation:d8 - dilation + tile_l, :]
    x_hi = x_ext_ref[d8 + dilation:d8 + dilation + tile_l, :]
    acc = jnp.dot(x_lo, w_dil_ref[0], preferred_element_type=jnp.float32)
    acc = acc + jnp.dot(x_t, w_dil_ref[1], preferred_element_type=jnp.float32)
    acc = acc + jnp.dot(x_hi, w_dil_ref[2], preferred_element_type=jnp.float32)

    # part_t (= fc_t(embed)) is constant along time: its conv contribution and
    # b_dil arrive as one precomputed f32 row vector.  Rows whose left/right
    # tap fell into the 'same' zero padding drop that tap's part_t term.
    t = l * tile_l + lax.broadcasted_iota(jnp.int32, (tile_l, 1), 0)
    acc = acc + pv[0:1, :]
    acc = acc - jnp.where(t < dilation, pv[1:2, :], 0.0)
    acc = acc - jnp.where(t >= seq_len - dilation, pv[2:3, :], 0.0)

    # Gated activation unit (f32 on VPU/EUP).
    gated = jnp.tanh(acc[:, :c_pad]) * jax.nn.sigmoid(acc[:, c_pad:])

    # Fused res|skip 1x1 convs: one lane-dense matmul, aligned lane split.
    rs = (jnp.dot(gated.astype(w_rs_ref.dtype), w_rs_ref[...],
                  preferred_element_type=jnp.float32)
          + b_rs_ref[...])                  # (tile_l, c_pad + s_pad) f32

    out_ref[0] = ((x_t.astype(jnp.float32) + rs[:, :c_pad])
                  * _SQRT_HALF).astype(out_ref.dtype)
    skip_ref[0] = rs[:, c_pad:].astype(skip_ref.dtype)


def residual_block_forward(x, emb, params, *, dilation, tile_l=1024,
                           compute_dtype=jnp.bfloat16):
    """Expected matmul-layout params:
       w_fc (E, C)  b_fc (1, C)
       w_dil (3, C, 2C)  b_dil (1, 2C)   (tap k multiplies h[t + (k-1)*dil])
       w_res (C, C)  b_res (1, C);  w_skip (C, S)  b_skip (1, S)
    """
    B, L, C = x.shape
    S = params["w_skip"].shape[-1]
    assert params["w_dil"].shape == (3, C, 2 * C)
    c_pad = _round_up(C, _LANE)
    s_pad = _round_up(S, _LANE)
    compute_dtype = jnp.dtype(compute_dtype)
    f32 = jnp.float32

    tile_l = _choose_tile_l(tile_l, L, B, dilation)
    l_pad = _round_up(L, tile_l)
    n_l = l_pad // tile_l
    d8 = _round_up(dilation, _SUB)                   # halo depth, tile-aligned

    # --- main conv input: channel-padded to full lanes, cast once ----------
    xp = _pad_axis(x, c_pad, 2).astype(compute_dtype)
    xp = _pad_axis(xp, l_pad, 1)                     # (B, l_pad, c_pad)

    # --- per-tile halos: 2*d8 rows/tile, zero outside [0, L) (tiny gather) --
    starts = jnp.arange(n_l, dtype=jnp.int32) * tile_l
    off = jnp.arange(d8, dtype=jnp.int32)
    t_idx = jnp.concatenate(
        [starts[:, None] - d8 + off[None, :],        # rows just before the tile
         starts[:, None] + tile_l + off[None, :]],   # rows just after the tile
        axis=1).reshape(-1)
    valid = ((t_idx >= 0) & (t_idx < L)).astype(compute_dtype)
    halo = xp[:, jnp.clip(t_idx, 0, l_pad - 1), :] * valid[None, :, None]
    halo = halo.reshape(B, n_l, 2 * d8, c_pad)

    # --- per-batch embedding terms, precomputed once in f32 ----------------
    part = (jnp.einsum("bie,ec->bc", emb.astype(f32), params["w_fc"].astype(f32))
            + params["b_fc"].astype(f32))                          # (B, C)
    p_tap = jnp.einsum("bc,kcd->bkd", part, params["w_dil"].astype(f32))  # (B,3,2C)
    p_all = params["b_dil"].astype(f32) + p_tap.sum(axis=1)               # (B, 2C)
    pvec = jnp.stack([p_all, p_tap[:, 0], p_tap[:, 2]], axis=1)           # (B,3,2C)
    pvec = jnp.concatenate([_pad_axis(pvec[..., :C], c_pad, 2),
                            _pad_axis(pvec[..., C:], c_pad, 2)], axis=2)
    pvec = _pad_axis(pvec, 8, 1).astype(f32)                      # (B, 8, 2*c_pad)

    # --- weights: pad channel dims to full lanes, fuse res|skip ------------
    w_dil = params["w_dil"]
    w_dil = jnp.concatenate([_pad_axis(w_dil[..., :C], c_pad, 2),
                             _pad_axis(w_dil[..., C:], c_pad, 2)], axis=2)
    w_dil = _pad_axis(w_dil, c_pad, 1).astype(compute_dtype)      # (3, c_pad, 2*c_pad)

    w_rs = jnp.concatenate(
        [_pad_axis(_pad_axis(params["w_res"], c_pad, 0), c_pad, 1),
         _pad_axis(_pad_axis(params["w_skip"], c_pad, 0), s_pad, 1)],
        axis=1).astype(compute_dtype)                             # (c_pad, c_pad+s_pad)
    b_rs = jnp.concatenate([_pad_axis(params["b_res"], c_pad, 1),
                            _pad_axis(params["b_skip"], s_pad, 1)],
                           axis=1).astype(f32)                    # (1, c_pad+s_pad)

    kernel = functools.partial(_residual_block_kernel, dilation=dilation,
                               seq_len=L, tile_l=tile_l, c_pad=c_pad, d8=d8)

    out_p, skip_p = pl.pallas_call(
        kernel,
        out_shape=(jax.ShapeDtypeStruct((B, l_pad, c_pad), x.dtype),
                   jax.ShapeDtypeStruct((B, l_pad, s_pad), x.dtype)),
        grid=(B, n_l),
        in_specs=[
            pl.BlockSpec((1, tile_l, c_pad), lambda b, l: (b, l, 0)),
            pl.BlockSpec((1, 1, 2 * d8, c_pad), lambda b, l: (b, l, 0, 0)),
            pl.BlockSpec((1, 8, 2 * c_pad), lambda b, l: (b, 0, 0)),
            pl.BlockSpec((3, c_pad, 2 * c_pad), lambda b, l: (0, 0, 0)),
            pl.BlockSpec((c_pad, c_pad + s_pad), lambda b, l: (0, 0)),
            pl.BlockSpec((1, c_pad + s_pad), lambda b, l: (0, 0)),
        ],
        out_specs=(pl.BlockSpec((1, tile_l, c_pad), lambda b, l: (b, l, 0)),
                   pl.BlockSpec((1, tile_l, s_pad), lambda b, l: (b, l, 0))),
        scratch_shapes=[pltpu.VMEM((tile_l + 2 * d8, c_pad), compute_dtype)],
        compiler_params=pltpu.CompilerParams(
            dimension_semantics=("parallel", "parallel"),
            vmem_limit_bytes=32 * 1024 * 1024),
    )(xp, halo, pvec, w_dil, w_rs, b_rs)

    return out_p[:, :L, :C], skip_p[:, :L, :S]


def _reference(x, emb, params, *, dilation):
    """Pure-JAX f32 reference matching the PyTorch forward semantics."""
    part_t = jnp.einsum("bie,ec->bic", emb, params["w_fc"]) + params["b_fc"]
    h = x + part_t
    B, L, C = x.shape
    hp = jnp.pad(h, ((0, 0), (dilation, dilation), (0, 0)))
    conv = jnp.broadcast_to(params["b_dil"], (B, L, 2 * C)).astype(jnp.float32)
    for k in range(3):
        conv = conv + jnp.einsum(
            "blc,cd->bld", hp[:, k * dilation:k * dilation + L],
            params["w_dil"][k])
    gated = jnp.tanh(conv[..., :C]) * jax.nn.sigmoid(conv[..., C:])
    res = jnp.einsum("blc,cd->bld", gated, params["w_res"]) + params["b_res"]
    skip = jnp.einsum("blc,cs->bls", gated, params["w_skip"]) + params["b_skip"]
    return (x + res) * math.sqrt(0.5), skip


if __name__ == "__main__":
    B, L = 2, 32
    res_channels = 8
    skip_channels = 8
    embed_dim = 32
    dilation = 2

    key = jax.random.PRNGKey(0)
    ks = jax.random.split(key, 12)
    scale = 0.1
    x = jax.random.normal(ks[0], (B, L, res_channels), jnp.float32)
    emb = jax.random.normal(ks[1], (B, 1, embed_dim), jnp.float32)
    params = {
        "w_fc":   scale * jax.random.normal(ks[2], (embed_dim, res_channels), jnp.float32),
        "b_fc":   scale * jax.random.normal(ks[3], (1, res_channels), jnp.float32),
        "w_dil":  scale * jax.random.normal(ks[4], (3, res_channels, 2 * res_channels), jnp.float32),
        "b_dil":  scale * jax.random.normal(ks[5], (1, 2 * res_channels), jnp.float32),
        "w_res":  scale * jax.random.normal(ks[6], (res_channels, res_channels), jnp.float32),
        "b_res":  scale * jax.random.normal(ks[7], (1, res_channels), jnp.float32),
        "w_skip": scale * jax.random.normal(ks[8], (res_channels, skip_channels), jnp.float32),
        "b_skip": scale * jax.random.normal(ks[9], (1, skip_channels), jnp.float32),
    }

    ref_out, ref_skip = _reference(x, emb, params, dilation=dilation)

    # Small tile (16) so the demo exercises the multi-tile path and the
    # halo crossing at the tile boundary.
    # (1) exact-semantics check with f32 matmul operands.
    fwd32 = jax.jit(functools.partial(residual_block_forward, dilation=dilation,
                                      tile_l=16, compute_dtype=jnp.float32))
    out32, skip32 = fwd32(x, emb, params)
    jax.block_until_ready((out32, skip32))
    assert out32.shape == x.shape and skip32.shape == (B, L, skip_channels)
    assert jnp.allclose(out32, ref_out, rtol=1e-3, atol=1e-3)
    assert jnp.allclose(skip32, ref_skip, rtol=1e-3, atol=1e-3)

    # (2) default perf path: bf16 matmul operands / HBM activations,
    #     f32 accumulation -> looser tolerance vs. the f32 reference.
    fwd_bf = jax.jit(functools.partial(residual_block_forward, dilation=dilation,
                                       tile_l=16))
    out_bf, skip_bf = fwd_bf(x, emb, params)
    jax.block_until_ready((out_bf, skip_bf))
    assert out_bf.shape == x.shape and skip_bf.shape == (B, L, skip_channels)
    assert jnp.allclose(out_bf, ref_out, rtol=3e-2, atol=3e-2)
    assert jnp.allclose(skip_bf, ref_skip, rtol=3e-2, atol=3e-2)

    print("KERNEL_OK")
</pallas_src>

<mosaic_0001>
module attributes {stable_mosaic.version = 11 : i64} {
  func.func @_residual_block_kernel(%arg0: i32, %arg1: i32, %arg2: memref<1x16x128xf32, #tpu.memory_space<vmem>>, %arg3: memref<1x1x32x128xf32, #tpu.memory_space<vmem>>, %arg4: memref<1x8x256xf32, #tpu.memory_space<vmem>>, %arg5: memref<3x128x256xf32, #tpu.memory_space<vmem>>, %arg6: memref<128x256xf32, #tpu.memory_space<vmem>>, %arg7: memref<1x256xf32, #tpu.memory_space<vmem>>, %arg8: memref<1x16x128xf32, #tpu.memory_space<vmem>>, %arg9: memref<1x16x128xf32, #tpu.memory_space<vmem>>, %arg10: memref<48x128xf32, #tpu.memory_space<vmem>>) attributes {dimension_semantics = [#tpu.dimension_semantics<parallel>, #tpu.dimension_semantics<parallel>], iteration_bounds = array<i64: 2, 2>, scalar_prefetch = 0 : i64, scratch_operands = 1 : i64, tpu.core_type = #tpu.core_type<tc>, window_params = [{transform_indices = @transform_0, window_bounds = array<i64: 1, 16, 128>}, {transform_indices = @transform_1, window_bounds = array<i64: 1, 1, 32, 128>}, {transform_indices = @transform_2, window_bounds = array<i64: 1, 8, 256>}, {pipeline_mode = #tpu.pipeline_mode<synchronous>, transform_indices = @transform_3, window_bounds = array<i64: 3, 128, 256>}, {pipeline_mode = #tpu.pipeline_mode<synchronous>, transform_indices = @transform_4, window_bounds = array<i64: 128, 256>}, {pipeline_mode = #tpu.pipeline_mode<synchronous>, transform_indices = @transform_5, window_bounds = array<i64: 1, 256>}, {transform_indices = @transform_6, window_bounds = array<i64: 1, 16, 128>}, {transform_indices = @transform_7, window_bounds = array<i64: 1, 16, 128>}]} {
    %c0 = arith.constant 0 : index
    %c0_0 = arith.constant 0 : index
    %c0_1 = arith.constant 0 : index
    %0 = vector.load %arg2[%c0, %c0_0, %c0_1] : memref<1x16x128xf32, #tpu.memory_space<vmem>>, vector<1x16x128xf32>
    %1 = vector.shape_cast %0 : vector<1x16x128xf32> to vector<16x128xf32>
    %c0_2 = arith.constant 0 : index
    %c0_3 = arith.constant 0 : index
    %c0_4 = arith.constant 0 : index
    %c0_5 = arith.constant 0 : index
    %2 = vector.load %arg3[%c0_2, %c0_3, %c0_4, %c0_5] : memref<1x1x32x128xf32, #tpu.memory_space<vmem>>, vector<1x1x32x128xf32>
    %3 = vector.shape_cast %2 : vector<1x1x32x128xf32> to vector<32x128xf32>
    %c0_6 = arith.constant 0 : index
    %c0_7 = arith.constant 0 : index
    %c0_8 = arith.constant 0 : index
    %4 = vector.load %arg4[%c0_6, %c0_7, %c0_8] : memref<1x8x256xf32, #tpu.memory_space<vmem>>, vector<1x8x256xf32>
    %5 = vector.shape_cast %4 : vector<1x8x256xf32> to vector<8x256xf32>
    %6 = vector.extract_strided_slice %3 {offsets = [0, 0], sizes = [16, 128], strides = [1, 1]} : vector<32x128xf32> to vector<16x128xf32>
    %c0_9 = arith.constant 0 : index
    %c0_10 = arith.constant 0 : index
    %7 = vector.load %arg10[%c0_9, %c0_10] : memref<48x128xf32, #tpu.memory_space<vmem>>, vector<16x128xf32>
    tpu.vector_store %arg10[%c0_9, %c0_10], %6 {strides = array<i32>} : memref<48x128xf32, #tpu.memory_space<vmem>>, vector<16x128xf32>,
    %c16 = arith.constant 16 : index
    %c0_11 = arith.constant 0 : index
    %8 = vector.load %arg10[%c16, %c0_11] : memref<48x128xf32, #tpu.memory_space<vmem>>, vector<16x128xf32>
    tpu.vector_store %arg10[%c16, %c0_11], %1 {strides = array<i32>} : memref<48x128xf32, #tpu.memory_space<vmem>>, vector<16x128xf32>,
    %9 = vector.extract_strided_slice %3 {offsets = [16, 0], sizes = [16, 128], strides = [1, 1]} : vector<32x128xf32> to vector<16x128xf32>
    %c32 = arith.constant 32 : index
    %c0_12 = arith.constant 0 : index
    %10 = vector.load %arg10[%c32, %c0_12] : memref<48x128xf32, #tpu.memory_space<vmem>>, vector<16x128xf32>
    tpu.vector_store %arg10[%c32, %c0_12], %9 {strides = array<i32>} : memref<48x128xf32, #tpu.memory_space<vmem>>, vector<16x128xf32>,
    %c14 = arith.constant 14 : index
    %c0_13 = arith.constant 0 : index
    %11 = vector.load %arg10[%c14, %c0_13] : memref<48x128xf32, #tpu.memory_space<vmem>>, vector<16x128xf32>
    %c18 = arith.constant 18 : index
    %c0_14 = arith.constant 0 : index
    %12 = vector.load %arg10[%c18, %c0_14] : memref<48x128xf32, #tpu.memory_space<vmem>>, vector<16x128xf32>
    %c0_15 = arith.constant 0 : index
    %c0_16 = arith.constant 0 : index
    %c0_17 = arith.constant 0 : index
    %13 = vector.load %arg5[%c0_15, %c0_16, %c0_17] : memref<3x128x256xf32, #tpu.memory_space<vmem>>, vector<1x128x256xf32>
    %14 = vector.shape_cast %13 : vector<1x128x256xf32> to vector<128x256xf32>
    %cst = arith.constant dense<0.000000e+00> : vector<16x256xf32>
    %15 = tpu.matmul %11, %14, %cst {dimension_numbers = #tpu.dot_dimension_numbers<[1], [0], [0], [1], [0, 0, 1, 1], [], []>} : vector<16x128xf32>, vector<128x256xf32>, vector<16x256xf32> -> vector<16x256xf32>
    %c1 = arith.constant 1 : index
    %c0_18 = arith.constant 0 : index
    %c0_19 = arith.constant 0 : index
    %16 = vector.load %arg5[%c1, %c0_18, %c0_19] : memref<3x128x256xf32, #tpu.memory_space<vmem>>, vector<1x128x256xf32>
    %17 = vector.shape_cast %16 : vector<1x128x256xf32> to vector<128x256xf32>
    %cst_20 = arith.constant dense<0.000000e+00> : vector<16x256xf32>
    %18 = tpu.matmul %1, %17, %cst_20 {dimension_numbers = #tpu.dot_dimension_numbers<[1], [0], [0], [1], [0, 0, 1, 1], [], []>} : vector<16x128xf32>, vector<128x256xf32>, vector<16x256xf32> -> vector<16x256xf32>
    %19 = arith.addf %15, %18 : vector<16x256xf32>
    %c2 = arith.constant 2 : index
    %c0_21 = arith.constant 0 : index
    %c0_22 = arith.constant 0 : index
    %20 = vector.load %arg5[%c2, %c0_21, %c0_22] : memref<3x128x256xf32, #tpu.memory_space<vmem>>, vector<1x128x256xf32>
    %21 = vector.shape_cast %20 : vector<1x128x256xf32> to vector<128x256xf32>
    %cst_23 = arith.constant dense<0.000000e+00> : vector<16x256xf32>
    %22 = tpu.matmul %12, %21, %cst_23 {dimension_numbers = #tpu.dot_dimension_numbers<[1], [0], [0], [1], [0, 0, 1, 1], [], []>} : vector<16x128xf32>, vector<128x256xf32>, vector<16x256xf32> -> vector<16x256xf32>
    %23 = arith.addf %19, %22 : vector<16x256xf32>
    %c16_i32 = arith.constant 16 : i32
    %24 = arith.muli %arg1, %c16_i32 : i32
    %25 = tpu.iota {dimensions = array<i32: 0>} : vector<16x1xi32>
    %26 = vector.broadcast %24 : i32 to vector<16x1xi32>
    %27 = arith.addi %26, %25 : vector<16x1xi32>
    %28 = vector.extract_strided_slice %5 {offsets = [0, 0], sizes = [1, 256], strides = [1, 1]} : vector<8x256xf32> to vector<1x256xf32>
    %29 = vector.broadcast %28 : vector<1x256xf32> to vector<16x256xf32>
    %30 = arith.addf %23, %29 : vector<16x256xf32>
    %c2_i32 = arith.constant 2 : i32
    %31 = vector.broadcast %c2_i32 : i32 to vector<16x1xi32>
    %32 = arith.cmpi slt, %27, %31 : vector<16x1xi32>
    %33 = vector.extract_strided_slice %5 {offsets = [1, 0], sizes = [1, 256], strides = [1, 1]} : vector<8x256xf32> to vector<1x256xf32>
    %cst_24 = arith.constant 0.000000e+00 : f32
    %34 = vector.shape_cast %32 : vector<16x1xi1> to vector<16x1xi1>
    %35 = vector.broadcast %34 : vector<16x1xi1> to vector<16x256xi1>
    %36 = vector.shape_cast %33 : vector<1x256xf32> to vector<1x256xf32>
    %37 = vector.broadcast %36 : vector<1x256xf32> to vector<16x256xf32>
    %38 = vector.broadcast %cst_24 : f32 to vector<16x256xf32>
    %39 = arith.select %35, %37, %38 : vector<16x256xi1>, vector<16x256xf32>
    %40 = arith.subf %30, %39 : vector<16x256xf32>
    %c30_i32 = arith.constant 30 : i32
    %41 = vector.broadcast %c30_i32 : i32 to vector<16x1xi32>
    %42 = arith.cmpi sge, %27, %41 : vector<16x1xi32>
    %43 = vector.extract_strided_slice %5 {offsets = [2, 0], sizes = [1, 256], strides = [1, 1]} : vector<8x256xf32> to vector<1x256xf32>
    %cst_25 = arith.constant 0.000000e+00 : f32
    %44 = vector.shape_cast %42 : vector<16x1xi1> to vector<16x1xi1>
    %45 = vector.broadcast %44 : vector<16x1xi1> to vector<16x256xi1>
    %46 = vector.shape_cast %43 : vector<1x256xf32> to vector<1x256xf32>
    %47 = vector.broadcast %46 : vector<1x256xf32> to vector<16x256xf32>
    %48 = vector.broadcast %cst_25 : f32 to vector<16x256xf32>
    %49 = arith.select %45, %47, %48 : vector<16x256xi1>, vector<16x256xf32>
    %50 = arith.subf %40, %49 : vector<16x256xf32>
    %51 = vector.extract_strided_slice %50 {offsets = [0, 0], sizes = [16, 128], strides = [1, 1]} : vector<16x256xf32> to vector<16x128xf32>
    %52 = math.tanh %51 : vector<16x128xf32>
    %53 = vector.extract_strided_slice %50 {offsets = [0, 128], sizes = [16, 128], strides = [1, 1]} : vector<16x256xf32> to vector<16x128xf32>
    %54 = arith.negf %53 : vector<16x128xf32>
    %55 = math.exp %54 : vector<16x128xf32>
    %cst_26 = arith.constant 1.000000e+00 : f32
    %56 = vector.broadcast %cst_26 : f32 to vector<16x128xf32>
    %57 = arith.addf %56, %55 : vector<16x128xf32>
    %58 = arith.divf %56, %57 : vector<16x128xf32>
    %59 = arith.mulf %52, %58 : vector<16x128xf32>
    %c0_27 = arith.constant 0 : index
    %c0_28 = arith.constant 0 : index
    %60 = vector.load %arg6[%c0_27, %c0_28] : memref<128x256xf32, #tpu.memory_space<vmem>>, vector<128x256xf32>
    %cst_29 = arith.constant dense<0.000000e+00> : vector<16x256xf32>
    %61 = tpu.matmul %59, %60, %cst_29 {dimension_numbers = #tpu.dot_dimension_numbers<[1], [0], [0], [1], [0, 0, 1, 1], [], []>} : vector<16x128xf32>, vector<128x256xf32>, vector<16x256xf32> -> vector<16x256xf32>
    %c0_30 = arith.constant 0 : index
    %c0_31 = arith.constant 0 : index
    %62 = vector.load %arg7[%c0_30, %c0_31] : memref<1x256xf32, #tpu.memory_space<vmem>>, vector<1x256xf32>
    %63 = vector.broadcast %62 : vector<1x256xf32> to vector<16x256xf32>
    %64 = arith.addf %61, %63 : vector<16x256xf32>
    %65 = vector.extract_strided_slice %64 {offsets = [0, 0], sizes = [16, 128], strides = [1, 1]} : vector<16x256xf32> to vector<16x128xf32>
    %66 = arith.addf %1, %65 : vector<16x128xf32>
    %cst_32 = arith.constant 0.707106769 : f32
    %67 = vector.broadcast %cst_32 : f32 to vector<16x128xf32>
    %68 = arith.mulf %66, %67 : vector<16x128xf32>
    %c0_33 = arith.constant 0 : index
    %c0_34 = arith.constant 0 : index
    %c0_35 = arith.constant 0 : index
    %69 = vector.load %arg8[%c0_33, %c0_34, %c0_35] : memref<1x16x128xf32, #tpu.memory_space<vmem>>, vector<1x16x128xf32>
    %70 = vector.shape_cast %69 : vector<1x16x128xf32> to vector<16x128xf32>
    %71 = vector.shape_cast %68 : vector<16x128xf32> to vector<1x16x128xf32>
    tpu.vector_store %arg8[%c0_33, %c0_34, %c0_35], %71 {strides = array<i32>} : memref<1x16x128xf32, #tpu.memory_space<vmem>>, vector<1x16x128xf32>,
    %72 = vector.extract_strided_slice %64 {offsets = [0, 128], sizes = [16, 128], strides = [1, 1]} : vector<16x256xf32> to vector<16x128xf32>
    %c0_36 = arith.constant 0 : index
    %c0_37 = arith.constant 0 : index
    %c0_38 = arith.constant 0 : index
    %73 = vector.load %arg9[%c0_36, %c0_37, %c0_38] : memref<1x16x128xf32, #tpu.memory_space<vmem>>, vector<1x16x128xf32>
    %74 = vector.shape_cast %73 : vector<1x16x128xf32> to vector<16x128xf32>
    %75 = vector.shape_cast %72 : vector<16x128xf32> to vector<1x16x128xf32>
    tpu.vector_store %arg9[%c0_36, %c0_37, %c0_38], %75 {strides = array<i32>} : memref<1x16x128xf32, #tpu.memory_space<vmem>>, vector<1x16x128xf32>,
    return
  }
  func.func @transform_0(%arg0: i32, %arg1: i32) -> (i32, i32, i32) {
    %c0_i32 = arith.constant 0 : i32
    %c0_i32_0 = arith.constant 0 : i32
    return %arg0, %arg1, %c0_i32 : i32, i32, i32
  }
  func.func @transform_1(%arg0: i32, %arg1: i32) -> (i32, i32, i32, i32) {
    %c0_i32 = arith.constant 0 : i32
    %c0_i32_0 = arith.constant 0 : i32
    %c0_i32_1 = arith.constant 0 : i32
    return %arg0, %arg1, %c0_i32, %c0_i32_0 : i32, i32, i32, i32
  }
  func.func @transform_2(%arg0: i32, %arg1: i32) -> (i32, i32, i32) {
    %c0_i32 = arith.constant 0 : i32
    %c0_i32_0 = arith.constant 0 : i32
    %c0_i32_1 = arith.constant 0 : i32
    return %arg0, %c0_i32, %c0_i32_0 : i32, i32, i32
  }
  func.func @transform_3(%arg0: i32, %arg1: i32) -> (i32, i32, i32) {
    %c0_i32 = arith.constant 0 : i32
    %c0_i32_0 = arith.constant 0 : i32
    %c0_i32_1 = arith.constant 0 : i32
    %c0_i32_2 = arith.constant 0 : i32
    return %c0_i32, %c0_i32_0, %c0_i32_1 : i32, i32, i32
  }
  func.func @transform_4(%arg0: i32, %arg1: i32) -> (i32, i32) {
    %c0_i32 = arith.constant 0 : i32
    %c0_i32_0 = arith.constant 0 : i32
    %c0_i32_1 = arith.constant 0 : i32
    return %c0_i32, %c0_i32_0 : i32, i32
  }
  func.func @transform_5(%arg0: i32, %arg1: i32) -> (i32, i32) {
    %c0_i32 = arith.constant 0 : i32
    %c0_i32_0 = arith.constant 0 : i32
    %c0_i32_1 = arith.constant 0 : i32
    return %c0_i32, %c0_i32_0 : i32, i32
  }
  func.func @transform_6(%arg0: i32, %arg1: i32) -> (i32, i32, i32) {
    %c0_i32 = arith.constant 0 : i32
    %c0_i32_0 = arith.constant 0 : i32
    return %arg0, %arg1, %c0_i32 : i32, i32, i32
  }
  func.func @transform_7(%arg0: i32, %arg1: i32) -> (i32, i32, i32) {
    %c0_i32 = arith.constant 0 : i32
    %c0_i32_0 = arith.constant 0 : i32
    return %arg0, %arg1, %c0_i32 : i32, i32, i32
  }
}

</mosaic_0001>

<bundles_post_ra>
// kernel: residual_block_forward.1
= control target key start
LH: loop header
LB: loop body
LE: loop exit
PB: predicated region body
PF: predicated region fallthrough
CT: control target
= control target key end

     0   :  { %s1487_s24 = smov 0   ;;  %s1489_s25 = smov 0   ;;  %s2000_s0 = inlined_call_operand.vmem [shape: f32[2,32,128], index: 0, kind: input, shape index: {}]   ;;  %s2001_s1 = inlined_call_operand.vmem [shape: f32[2,2,32,128], index: 1, kind: input, shape index: {}]   ;;  %s2002_s2 = inlined_call_operand.vmem [shape: f32[2,8,256], index: 2, kind: input, shape index: {}]   ;;  %s2003_s3 = inlined_call_operand.vmem [shape: f32[3,128,256], index: 3, kind: input, shape index: {}]   ;;  %s2004_s4 = inlined_call_operand.vmem [shape: f32[128,256], index: 4, kind: input, shape index: {}]   ;;  %s2005_s5 = inlined_call_operand.vmem [shape: f32[1,256], index: 5, kind: input, shape index: {}]   ;;  %s2006_s6 = inlined_call_operand.vmem [shape: f32[2,32,128], index: 6, kind: output, shape index: {0}]   ;;  %s2007_s7 = inlined_call_operand.vmem [shape: f32[2,32,128], index: 7, kind: output, shape index: {1}]  }
   0x1   :  { %s1491_s26 = smov 0   ;;  %s1493_s27 = smov 0  }
   0x2   :  { %s1495_s28 = smov 0  }
   0x3 LB: > { %s27_s29 = sadd.s32 1, %s1436_s26  ;;  %s30_s30 = sadd.s32 1, %s1440_s27  ;;  %s1444_s28 = sphi %s1495_s28, %s18_s28   ;;  %s1440_s27 = sphi %s1493_s27, %s2011_s27   ;;  %s1436_s26 = sphi %s1491_s26, %s2010_s26   ;;  %s1432_s25 = sphi %s1489_s25, %s2009_s25   ;;  %s1428_s24 = sphi %s1487_s24, %s2008_s24  }
   0x4   : > { %p28_p0 = scmp.ge.s32.totalorder %s27_s29, 2  ;;  %p1132_p1 = scmp.ge.s32.totalorder %s1444_s28, 1 }
   0x5   : > { %p289_p2 = scmp.lt.s32.totalorder %s1444_s28, 5 }
   0x6   : > { %s2013_s29 = smov (%p28_p0, %s27_s29), 0  ;;  %s2015_s30 = smov (!%p28_p0, %s30_s30), %s1440_s27 }
   0x7   : > { %p290_p3 = pnand %p1132_p1, %p289_p2  ;;  %p32_p4 = scmp.ge.s32.totalorder %s2015_s30, 2 }
   0x8   : > { %v415_v0 = vld [vmem:[%s2003_s3 + $0x8] sm:$0xff] (!%p290_p3)  ;;  %v417_v1 = vld [vmem:[%s2003_s3 + $0x18] sm:$0xff] (!%p290_p3)  ;;  %v414_v2 = vld [vmem:[%s2003_s3] sm:$0xff] (!%p290_p3)  ;;  %s1133_s14 = sshll.u32 (!%p290_p3), %s1428_s24, 1  ;;  %p353_p5 = scmp.lt.s32.totalorder (!%p290_p3), %s1432_s25, 1  ;;  %v1446_v7 = vmov (!%p290_p3), 0.0  }
   0x9   : > { %s2017_s30 = smov (%p32_p4, %s2015_s30), 0  ;;  %293 = sbr.rel (%p290_p3) target bundleno = 548 (0x224), region = 44 }
   0xa   : > { %v1249_v3 = vpack.c.bf16 (!%p290_p3), %v417_v1, %v415_v0  ;;  %v416_v4 = vld [vmem:[%s2003_s3 + $0x10] sm:$0xff] (!%p290_p3)  ;;  %v419_v5 = vld [vmem:[%s2003_s3 + $0x28] sm:$0xff] (!%p290_p3)  ;;  %v421_v6 = vld [vmem:[%s2003_s3 + $0x38] sm:$0xff] (!%p290_p3)  ;;  %620 = vmatprep.mubr.f32.mxu0 (!%p290_p3), %v1446_v7  ;;  %p355_p6 = scmp.lt.s32.totalorder (!%p290_p3), %s1133_s14, 3  ;;  %543 = vmatprep.mubr.f32.mxu1 (!%p290_p3), %v1446_v7  ;;  %p364_p7 = scmp.lt.s32.totalorder (!%p290_p3), %s1428_s24, 1 }
   0xb   : > { %v1251_v8 = vpack.c.bf16 (!%p290_p3), %v416_v4, %v414_v2  ;;  %v1253_v9 = vpack.c.bf16 (!%p290_p3), %v421_v6, %v419_v5  ;;  %v418_v10 = vld [vmem:[%s2003_s3 + $0x20] sm:$0xff] (!%p290_p3)  ;;  %v420_v11 = vld [vmem:[%s2003_s3 + $0x30] sm:$0xff] (!%p290_p3)  ;;  %v423_v12 = vld [vmem:[%s2003_s3 + $0x48] sm:$0xff] (!%p290_p3)  ;;  %s1211_s12 = sshll.u32 (!%p290_p3), %s1428_s24, 4 }
   0xc   : > { %1250 = vmatprep.subr.bf16.mxu0 (!%p290_p3), %v1249_v3  ;;  %v425_v13 = vld [vmem:[%s2003_s3 + $0x58] sm:$0xff] (!%p290_p3)  ;;  %v1255_v14 = vpack.c.bf16 (!%p290_p3), %v420_v11, %v418_v10  ;;  %v422_v16 = vld [vmem:[%s2003_s3 + $0x40] sm:$0xff] (!%p290_p3)  ;;  %v424_v17 = vld [vmem:[%s2003_s3 + $0x50] sm:$0xff] (!%p290_p3) }
   0xd   : > { %1252 = vmatpush1.bf16.msra.mxu0 (!%p290_p3), %v1251_v8  ;;  %v1257_v15 = vpack.c.bf16 (!%p290_p3), %v425_v13, %v423_v12  ;;  %v427_v18 = vld [vmem:[%s2003_s3 + $0x68] sm:$0xff] (!%p290_p3)  ;;  %v429_v19 = vld [vmem:[%s2003_s3 + $0x78] sm:$0xff] (!%p290_p3)  ;;  %v1259_v20 = vpack.c.bf16 (!%p290_p3), %v424_v17, %v422_v16  ;;  %v426_v22 = vld [vmem:[%s2003_s3 + $0x60] sm:$0xff] (!%p290_p3) }
   0xe   : > { %1254 = vmatprep.subr.bf16.mxu0 (!%p290_p3), %v1253_v9  ;;  %v1261_v21 = vpack.c.bf16 (!%p290_p3), %v429_v19, %v427_v18  ;;  %v428_v23 = vld [vmem:[%s2003_s3 + $0x70] sm:$0xff] (!%p290_p3)  ;;  %v431_v24 = vld [vmem:[%s2003_s3 + $0x88] sm:$0xff] (!%p290_p3)  ;;  %v433_v25 = vld [vmem:[%s2003_s3 + $0x98] sm:$0xff] (!%p290_p3) }
   0xf   : > { %v1148_v26 = vld [vmem:[%s2003_s3 + $0x108] sm:$0xff] (!%p290_p3)  ;;  %v1150_v27 = vld [vmem:[%s2003_s3 + $0x118] sm:$0xff] (!%p290_p3)  ;;  %v1147_v28 = vld [vmem:[%s2003_s3 + $0x100] sm:$0xff] (!%p290_p3)  ;;  %v1263_v30 = vpack.c.bf16 (!%p290_p3), %v428_v23, %v426_v22  ;;  %v1265_v36 = vpack.c.bf16 (!%p290_p3), %v433_v25, %v431_v24 }
  0x10   : > { %s2019_s25 = smov (!%p353_p5, %s1432_s25), 1  ;;  %s2021_s14 = smov (!%p355_p6, %s1133_s14), 3  ;;  %v1149_v29 = vld [vmem:[%s2003_s3 + $0x110] sm:$0xff]  ;;  %v430_v31 = vld [vmem:[%s2003_s3 + $0x80] sm:$0xff]  ;;  %v1217_v33 = vpack.c.bf16 %v1150_v27, %v1148_v26  ;;  %v435_v37 = vld [vmem:[%s2003_s3 + $0xa8] sm:$0xff] }
  0x11   : > { %s1134_s13 = sshll.u32 %s2019_s25, 2  ;;  %s1137_s9 = sshll.u32 %s2019_s25, 3  ;;  %1256 = vmatpush1.bf16.msra.mxu0 %v1255_v14  ;;  %v432_v32 = vld [vmem:[%s2003_s3 + $0x90] sm:$0xff]  ;;  %v1219_v34 = vpack.c.bf16 %v1149_v29, %v1147_v28  ;;  %v437_v38 = vld [vmem:[%s2003_s3 + $0xb8] sm:$0xff]  ;;  %v1152_v39 = vld [vmem:[%s2003_s3 + $0x128] sm:$0xff] }
  0x12   : > { %s358_s19 = sadd.s32 %s1134_s13, %s2021_s14  ;;  %1258 = vmatprep.subr.bf16.mxu0 %v1257_v15  ;;  %1218 = vmatprep.subr.bf16.mxu1 %v1217_v33  ;;  %v1154_v41 = vld [vmem:[%s2003_s3 + $0x138] sm:$0xff]  ;;  %v1151_v42 = vld [vmem:[%s2003_s3 + $0x120] sm:$0xff]  ;;  %v1153_v43 = vld [vmem:[%s2003_s3 + $0x130] sm:$0xff]  ;;  %v1267_v44 = vpack.c.bf16 %v432_v32, %v430_v31  ;;  %v1269_v49 = vpack.c.bf16 %v437_v38, %v435_v37 }
  0x13   : > { %s1574_s8 = sshll.u32 %s358_s19, 3  ;;  %1220 = vmatpush1.bf16.msra.mxu1 %v1219_v34  ;;  %v434_v45 = vld [vmem:[%s2003_s3 + $0xa0] sm:$0xff]  ;;  %v436_v46 = vld [vmem:[%s2003_s3 + $0xb0] sm:$0xff]  ;;  %v1221_v47 = vpack.c.bf16 %v1154_v41, %v1152_v39  ;;  %v1223_v48 = vpack.c.bf16 %v1153_v43, %v1151_v42  ;;  %v439_v50 = vld [vmem:[%s2003_s3 + $0xc8] sm:$0xff] }
  0x14   : > { %s365_s10 = scalar_select %p364_p7, %s1428_s24, 1  ;;  %v1156_v51 = vld [vmem:[%s2003_s3 + $0x148] sm:$0xff]  ;;  %v1158_v52 = vld [vmem:[%s2003_s3 + $0x158] sm:$0xff]  ;;  %v1155_v55 = vld [vmem:[%s2003_s3 + $0x140] sm:$0xff]  ;;  %v1271_v58 = vpack.c.bf16 %v436_v46, %v434_v45 }
  0x15   : > { %s1588_s17 = scalar_lea.vmem %s2000_s0, %s1574_s8  ;;  %1260 = vmatpush1.bf16.msra.mxu0 %v1259_v20  ;;  %v441_v53 = vld [vmem:[%s2003_s3 + $0xd8] sm:$0xff]  ;;  %1222 = vmatprep.subr.bf16.mxu1 %v1221_v47  ;;  %v1225_v54 = vpack.c.bf16 %v1158_v52, %v1156_v51  ;;  %v1157_v56 = vld [vmem:[%s2003_s3 + $0x150] sm:$0xff]  ;;  %v1160_v59 = vld [vmem:[%s2003_s3 + $0x168] sm:$0xff]  ;;  %s394_s15 = scalar_lea.vmem %s2007_s7, %s1574_s8 }
  0x16   : > { %s1136_s11 = sshll.u32 %s365_s10, 2  ;;  %v1615_v35 = vld [vmem:[%s1588_s17] sm:$0xff]  ;;  %1262 = vmatprep.subr.bf16.mxu0 %v1261_v21  ;;  %v1227_v57 = vpack.c.bf16 %v1157_v56, %v1155_v55  ;;  %v1162_v60 = vld [vmem:[%s2003_s3 + $0x178] sm:$0xff]  ;;  %v1273_v62 = vpack.c.bf16 %v441_v53, %v439_v50  ;;  %v440_v0 = vld [vmem:[%s2003_s3 + $0xd0] sm:$0xff]  ;;  %s384_s20 = scalar_lea.vmem %s2006_s6, %s1574_s8 }
  0x17   : > { %s368_s19 = sadd.s32 %s1137_s9, %s1136_s11  ;;  %406 = vst [vmem:[#allocation2 + $0x10] sm:$0xff] %v1615_v35  ;;  %1224 = vmatpush1.bf16.msra.mxu1 %v1223_v48  ;;  %v1159_v61 = vld [vmem:[%s2003_s3 + $0x160] sm:$0xff]  ;;  %v1229_v1 = vpack.c.bf16 %v1162_v60, %v1160_v59  ;;  %v1161_v2 = vld [vmem:[%s2003_s3 + $0x170] sm:$0xff]  ;;  %v443_v3 = vld [vmem:[%s2003_s3 + $0xe8] sm:$0xff] }
  0x18   : > { %s1138_s23 = sshll.u32 %s368_s19, 3  ;;  %1226 = vmatprep.subr.bf16.mxu1 %v1225_v54  ;;  %v438_v63 = vld [vmem:[%s2003_s3 + $0xc0] sm:$0xff]  ;;  %v445_v4 = vld [vmem:[%s2003_s3 + $0xf8] sm:$0xff]  ;;  %v1231_v5 = vpack.c.bf16 %v1161_v2, %v1159_v61  ;;  %v1164_v6 = vld [vmem:[%s2003_s3 + $0x188] sm:$0xff] }
  0x19   : > { %s1626_s16 = scalar_lea.vmem %s2001_s1, %s1138_s23  ;;  %1264 = vmatpush1.bf16.msra.mxu0 %v1263_v30  ;;  %v1166_v8 = vld [vmem:[%s2003_s3 + $0x198] sm:$0xff]  ;;  %v1275_v9 = vpack.c.bf16 %v440_v0, %v438_v63  ;;  %v1163_v11 = vld [vmem:[%s2003_s3 + $0x180] sm:$0xff]  ;;  %v1165_v12 = vld [vmem:[%s2003_s3 + $0x190] sm:$0xff]  ;;  %v1277_v13 = vpack.c.bf16 %v445_v4, %v443_v3  ;;  %s1216_s23 = sshll.u32 %s2019_s25, 4 }
  0x1a   : > { %v399_v40 = vld [vmem:[%s1626_s16 + $0x8] sm:$0xff]  ;;  %1266 = vmatprep.subr.bf16.mxu0 %v1265_v36  ;;  %v1233_v10 = vpack.c.bf16 %v1166_v8, %v1164_v6  ;;  %v442_v14 = vld [vmem:[%s2003_s3 + $0xe0] sm:$0xff]  ;;  %v444_v15 = vld [vmem:[%s2003_s3 + $0xf0] sm:$0xff]  ;;  %v1235_v20 = vpack.c.bf16 %v1165_v12, %v1163_v11  ;;  %s375_s11 = scalar_lea.vmem %s2002_s2, %s1216_s23 }
  0x1b   : > { %405 = vst [vmem:[#allocation2 + $0x8] sm:$0xff] %v399_v40  ;;  %1228 = vmatpush1.bf16.msra.mxu1 %v1227_v57  ;;  %v1168_v16 = vld [vmem:[%s2003_s3 + $0x1a8] sm:$0xff]  ;;  %v1182_v18 = vld [vmem:[%s2003_s3 + $0x218] sm:$0xff]  ;;  %v1279_v21 = vpack.c.bf16 %v444_v15, %v442_v14  ;;  %v1179_v22 = vld [vmem:[%s2003_s3 + $0x200] sm:$0xff] }
  0x1c   : > { %1230 = vmatprep.subr.bf16.mxu1 %v1229_v1  ;;  %v1180_v17 = vld [vmem:[%s2003_s3 + $0x208] sm:$0xff]  ;;  %v1170_v19 = vld [vmem:[%s2003_s3 + $0x1b8] sm:$0xff]  ;;  %v1167_v24 = vld [vmem:[%s2003_s3 + $0x1a0] sm:$0xff] }
  0x1d   : > { %1268 = vmatpush1.bf16.msra.mxu0 %v1267_v44  ;;  %v1237_v23 = vpack.c.bf16 %v1170_v19, %v1168_v16  ;;  %v1169_v25 = vld [vmem:[%s2003_s3 + $0x1b0] sm:$0xff]  ;;  %v1281_v26 = vpack.c.bf16 %v1182_v18, %v1180_v17  ;;  %v1172_v28 = vld [vmem:[%s2003_s3 + $0x1c8] sm:$0xff]  ;;  %v1174_v29 = vld [vmem:[%s2003_s3 + $0x1d8] sm:$0xff] }
  0x1e   : > { %1270 = vmatprep.subr.bf16.mxu0 %v1269_v49  ;;  %v1181_v27 = vld [vmem:[%s2003_s3 + $0x210] sm:$0xff]  ;;  %v1184_v30 = vld [vmem:[%s2003_s3 + $0x228] sm:$0xff]  ;;  %v1186_v31 = vld [vmem:[%s2003_s3 + $0x238] sm:$0xff]  ;;  %v1239_v34 = vpack.c.bf16 %v1169_v25, %v1167_v24  ;;  %v1241_v37 = vpack.c.bf16 %v1174_v29, %v1172_v28 }
  0x1f   : > { %1232 = vmatpush1.bf16.msra.mxu1 %v1231_v5  ;;  %v1183_v33 = vld [vmem:[%s2003_s3 + $0x220] sm:$0xff]  ;;  %v1283_v36 = vpack.c.bf16 %v1181_v27, %v1179_v22  ;;  %v1173_v39 = vld [vmem:[%s2003_s3 + $0x1d0] sm:$0xff]  ;;  %v1754_v40 = vld [vmem:[%s1588_s17 + $0x8] sm:$0xff]  ;;  %v1285_v41 = vpack.c.bf16 %v1186_v31, %v1184_v30 }
  0x20   : > { %1234 = vmatprep.subr.bf16.mxu1 %v1233_v10  ;;  %v1171_v38 = vld [vmem:[%s2003_s3 + $0x1c0] sm:$0xff]  ;;  %v1185_v42 = vld [vmem:[%s2003_s3 + $0x230] sm:$0xff]  ;;  %v1176_v43 = vld [vmem:[%s2003_s3 + $0x1e8] sm:$0xff]  ;;  %407 = vst [vmem:[#allocation2 + $0x18] sm:$0xff] %v1754_v40 }
  0x21   : > { %1272 = vmatpush1.bf16.msra.mxu0 %v1271_v58  ;;  %v1178_v44 = vld [vmem:[%s2003_s3 + $0x1f8] sm:$0xff]  ;;  %v1188_v45 = vld [vmem:[%s2003_s3 + $0x248] sm:$0xff]  ;;  %v400_v47 = vld [vmem:[%s1626_s16 + $0x10] sm:$0xff]  ;;  %v1243_v48 = vpack.c.bf16 %v1173_v39, %v1171_v38  ;;  %v1287_v49 = vpack.c.bf16 %v1185_v42, %v1183_v33 }
  0x22   : > { %1274 = vmatprep.subr.bf16.mxu0 %v1273_v62  ;;  %v410_v32 = vld [vmem:[#allocation2 + $0xe] sm:$0xff]  ;;  %v1190_v46 = vld [vmem:[%s2003_s3 + $0x258] sm:$0xff]  ;;  %408 = vst [vmem:[#allocation2 + $0x20] sm:$0xff] %v400_v47  ;;  %v1245_v50 = vpack.c.bf16 %v1178_v44, %v1176_v43  ;;  %v1175_v51 = vld [vmem:[%s2003_s3 + $0x1e0] sm:$0xff] }
  0x23   : > { %1236 = vmatpush1.bf16.msra.mxu1 %v1235_v20  ;;  %v1177_v52 = vld [vmem:[%s2003_s3 + $0x1f0] sm:$0xff]  ;;  %v1289_v53 = vpack.c.bf16 %v1190_v46, %v1188_v45  ;;  %v1187_v54 = vld [vmem:[%s2003_s3 + $0x240] sm:$0xff]  ;;  %v1192_v56 = vld [vmem:[%s2003_s3 + $0x268] sm:$0xff] }
  0x24   : > { %1238 = vmatprep.subr.bf16.mxu1 %v1237_v23  ;;  %v1189_v55 = vld [vmem:[%s2003_s3 + $0x250] sm:$0xff]  ;;  %v1194_v57 = vld [vmem:[%s2003_s3 + $0x278] sm:$0xff]  ;;  %v1247_v58 = vpack.c.bf16 %v1177_v52, %v1175_v51  ;;  %v1191_v62 = vld [vmem:[%s2003_s3 + $0x260] sm:$0xff] }
  0x25   : > { %1276 = vmatpush1.bf16.msra.mxu0 %v1275_v9  ;;  %v1291_v59 = vpack.c.bf16 %v1189_v55, %v1187_v54  ;;  %v1293_v61 = vpack.c.bf16 %v1194_v57, %v1192_v56  ;;  %v1193_v63 = vld [vmem:[%s2003_s3 + $0x270] sm:$0xff]  ;;  %v1196_v0 = vld [vmem:[%s2003_s3 + $0x288] sm:$0xff]  ;;  %v1198_v1 = vld [vmem:[%s2003_s3 + $0x298] sm:$0xff] }
  0x26   : > { %1278 = vmatprep.subr.bf16.mxu0 %v1277_v13  ;;  %v1295_v2 = vpack.c.bf16 %v1193_v63, %v1191_v62  ;;  %v1297_v3 = vpack.c.bf16 %v1198_v1, %v1196_v0  ;;  %v1195_v4 = vld [vmem:[%s2003_s3 + $0x280] sm:$0xff]  ;;  %v1197_v5 = vld [vmem:[%s2003_s3 + $0x290] sm:$0xff]  ;;  %v1200_v6 = vld [vmem:[%s2003_s3 + $0x2a8] sm:$0xff] }
  0x27   : > { %1240 = vmatpush1.bf16.msra.mxu1 %v1239_v34  ;;  %v411_v60 = vld [vmem:[#allocation2 + $0x16] sm:$0xff]  ;;  %v1299_v9 = vpack.c.bf16 %v1197_v5, %v1195_v4  ;;  %v1199_v11 = vld [vmem:[%s2003_s3 + $0x2a0] sm:$0xff]  ;;  %v1204_v13 = vld [vmem:[%s2003_s3 + $0x2c8] sm:$0xff] }
  0x28   : > { %1242 = vmatprep.subr.bf16.mxu1 %v1241_v37  ;;  %v1202_v8 = vld [vmem:[%s2003_s3 + $0x2b8] sm:$0xff]  ;;  %v1201_v12 = vld [vmem:[%s2003_s3 + $0x2b0] sm:$0xff]  ;;  %v1203_v17 = vld [vmem:[%s2003_s3 + $0x2c0] sm:$0xff] }
  0x29   : > { %1280 = vmatpush1.bf16.msra.mxu0 %v1279_v21  ;;  %v1301_v10 = vpack.c.bf16 %v1202_v8, %v1200_v6  ;;  %v1206_v14 = vld [vmem:[%s2003_s3 + $0x2d8] sm:$0xff]  ;;  %v1303_v15 = vpack.c.bf16 %v1201_v12, %v1199_v11  ;;  %v1205_v18 = vld [vmem:[%s2003_s3 + $0x2d0] sm:$0xff]  ;;  %v1208_v19 = vld [vmem:[%s2003_s3 + $0x2e8] sm:$0xff] }
  0x2a   : > { %1282 = vmatprep.subr.bf16.mxu0 %v1281_v26  ;;  %v1305_v16 = vpack.c.bf16 %v1206_v14, %v1204_v13  ;;  %v1210_v20 = vld [vmem:[%s2003_s3 + $0x2f8] sm:$0xff]  ;;  %v1307_v21 = vpack.c.bf16 %v1205_v18, %v1203_v17  ;;  %v1207_v23 = vld [vmem:[%s2003_s3 + $0x2e0] sm:$0xff]  ;;  %v1209_v24 = vld [vmem:[%s2003_s3 + $0x2f0] sm:$0xff] }
  0x2b   : > { %1244 = vmatpush1.bf16.msra.mxu1 %v1243_v48  ;;  %v1309_v22 = vpack.c.bf16 %v1210_v20, %v1208_v19  ;;  %v1311_v25 = vpack.c.bf16 %v1209_v24, %v1207_v23  ;;  %v412_v26 = vld [vmem:[#allocation2 + $0x12] sm:$0xff]  ;;  %v413_v27 = vld [vmem:[#allocation2 + $0x1a] sm:$0xff]  ;;  %v827_v28 = vld [vmem:[%s2004_s4 + $0x8] sm:$0xff]  ;;  %v748_v19 = vlaneseq }
  0x2c   : > { %621 = vmatmul.mubr.f32.vlgmr.msra.gmra.mrb[0].mxu0 %v410_v32  ;;  %1246 = vmatprep.subr.bf16.mxu1 %v1245_v50  ;;  %v829_v29 = vld [vmem:[%s2004_s4 + $0x18] sm:$0xff]  ;;  %v826_v31 = vld [vmem:[%s2004_s4] sm:$0xff]  ;;  %v828_v32 = vld [vmem:[%s2004_s4 + $0x10] sm:$0xff] }
  0x2d   : > { %1284 = vmatpush1.bf16.msra.mxu0 %v1283_v36  ;;  %626 = vmatprep.mubr.f32.mxu0 %v1446_v7  ;;  %v1313_v30 = vpack.c.bf16 %v829_v29, %v827_v28  ;;  %v1315_v33 = vpack.c.bf16 %v828_v32, %v826_v31  ;;  %v831_v34 = vld [vmem:[%s2004_s4 + $0x28] sm:$0xff]  ;;  %v833_v36 = vld [vmem:[%s2004_s4 + $0x38] sm:$0xff]  ;;  %v830_v38 = vld [vmem:[%s2004_s4 + $0x20] sm:$0xff]  ;;  %v749_v20 = vshrl.u32 %v748_v19, 7 }
  0x2e   : > { %1286 = vmatprep.subr.bf16.mxu0 %v1285_v41  ;;  %v1317_v37 = vpack.c.bf16 %v833_v36, %v831_v34  ;;  %v832_v39 = vld [vmem:[%s2004_s4 + $0x30] sm:$0xff]  ;;  %v835_v42 = vld [vmem:[%s2004_s4 + $0x48] sm:$0xff]  ;;  %v837_v43 = vld [vmem:[%s2004_s4 + $0x58] sm:$0xff] }
  0x2f   : > { %1248 = vmatpush1.bf16.msra.mxu1 %v1247_v58  ;;  %v1319_v41 = vpack.c.bf16 %v832_v39, %v830_v38  ;;  %v1321_v44 = vpack.c.bf16 %v837_v43, %v835_v42  ;;  %v834_v45 = vld [vmem:[%s2004_s4 + $0x40] sm:$0xff]  ;;  %v836_v46 = vld [vmem:[%s2004_s4 + $0x50] sm:$0xff]  ;;  %v839_v48 = vld [vmem:[%s2004_s4 + $0x68] sm:$0xff]  ;;  %v1955_v24 = vsub.s32 0, %v749_v20 }
  0x30   : > { %627 = vmatmul.mubr.f32.gmra.mrb[2].mxu0 %v411_v60  ;;  %1314 = vmatprep.subr.bf16.mxu1 %v1313_v30  ;;  %v1323_v47 = vpack.c.bf16 %v836_v46, %v834_v45  ;;  %v838_v51 = vld [vmem:[%s2004_s4 + $0x60] sm:$0xff]  ;;  %v840_v52 = vld [vmem:[%s2004_s4 + $0x70] sm:$0xff]  ;;  %v843_v54 = vld [vmem:[%s2004_s4 + $0x88] sm:$0xff] }
  0x31   : > { %1288 = vmatpush1.bf16.msra.mxu0 %v1287_v49  ;;  %730 = vmatprep.mubr.f32.mxu0 %v1446_v7  ;;  %v841_v49 = vld [vmem:[%s2004_s4 + $0x78] sm:$0xff]  ;;  %v842_v57 = vld [vmem:[%s2004_s4 + $0x80] sm:$0xff]  ;;  %v844_v58 = vld [vmem:[%s2004_s4 + $0x90] sm:$0xff] }
  0x32   : > { %1290 = vmatprep.subr.bf16.mxu0 %v1289_v53  ;;  %544 = vmatmul.mubr.f32.vlgmr.msra.gmra.mrb[0].mxu1 %v1615_v35  ;;  %v1325_v50 = vpack.c.bf16 %v841_v49, %v839_v48  ;;  %v1327_v53 = vpack.c.bf16 %v840_v52, %v838_v51  ;;  %v845_v55 = vld [vmem:[%s2004_s4 + $0x98] sm:$0xff]  ;;  %v847_v60 = vld [vmem:[%s2004_s4 + $0xa8] sm:$0xff]  ;;  %v846_v63 = vld [vmem:[%s2004_s4 + $0xa0] sm:$0xff] }
  0x33   : > { %549 = vmatprep.mubr.f32.mxu1 %v1446_v7  ;;  %1316 = vmatpush1.bf16.msra.mxu1 %v1315_v33  ;;  %v1329_v56 = vpack.c.bf16 %v845_v55, %v843_v54  ;;  %v848_v0 = vld [vmem:[%s2004_s4 + $0xb0] sm:$0xff]  ;;  %v850_v5 = vld [vmem:[%s2004_s4 + $0xc0] sm:$0xff] }
  0x34   : > { %1318 = vmatprep.subr.bf16.mxu1 %v1317_v37  ;;  %v1335_v1 = vpack.c.bf16 %v848_v0, %v846_v63  ;;  %v852_v6 = vld [vmem:[%s2004_s4 + $0xd0] sm:$0xff]  ;;  %v854_v11 = vld [vmem:[%s2004_s4 + $0xe0] sm:$0xff] }
  0x35   : > { %1292 = vmatpush1.bf16.msra.mxu0 %v1291_v59  ;;  %v1331_v59 = vpack.c.bf16 %v844_v58, %v842_v57  ;;  %v1339_v8 = vpack.c.bf16 %v852_v6, %v850_v5  ;;  %v856_v13 = vld [vmem:[%s2004_s4 + $0xf0] sm:$0xff] }
  0x36   : > { %1294 = vmatprep.subr.bf16.mxu0 %v1293_v61  ;;  %550 = vmatmul.mubr.f32.gmra.mrb[2].mxu1 %v1754_v40  ;;  %v849_v61 = vld [vmem:[%s2004_s4 + $0xb8] sm:$0xff]  ;;  %v1343_v14 = vpack.c.bf16 %v856_v13, %v854_v11 }
  0x37   : > { %934 = vmatprep.mubr.f32.mxu1 %v1446_v7  ;;  %1320 = vmatpush1.bf16.msra.mxu1 %v1319_v41  ;;  %v1333_v62 = vpack.c.bf16 %v849_v61, %v847_v60  ;;  %v402_v41 = vld [vmem:[%s375_s11] sm:$0xff] }
  0x38   : > { %1322 = vmatprep.subr.bf16.mxu1 %v1321_v44  ;;  %v757_v48 = vrot.slane %v402_v41, %v1955_v24 }
  0x39   : > { %1296 = vmatpush1.bf16.msra.mxu0 %v1295_v2  ;;  %v851_v2 = vld [vmem:[%s2004_s4 + $0xc8] sm:$0xff] }
  0x3a   : > { %1298 = vmatprep.subr.bf16.mxu0 %v1297_v3  ;;  %v853_v3 = vld [vmem:[%s2004_s4 + $0xd8] sm:$0xff] }
  0x3b   : > { %1324 = vmatpush1.bf16.msra.mxu1 %v1323_v47  ;;  %v1337_v4 = vpack.c.bf16 %v853_v3, %v851_v2 }
  0x3c   : > { %1326 = vmatprep.subr.bf16.mxu1 %v1325_v50 }
  0x3d   : > { %1300 = vmatpush1.bf16.msra.mxu0 %v1299_v9  ;;  %v855_v9 = vld [vmem:[%s2004_s4 + $0xe8] sm:$0xff] }
  0x3e   : > { %1302 = vmatprep.subr.bf16.mxu0 %v1301_v10  ;;  %v857_v10 = vld [vmem:[%s2004_s4 + $0xf8] sm:$0xff] }
  0x3f   : > { %1328 = vmatpush1.bf16.msra.mxu1 %v1327_v53  ;;  %v1341_v12 = vpack.c.bf16 %v857_v10, %v855_v9 }
  0x40   : > { %1330 = vmatprep.subr.bf16.mxu1 %v1329_v56 }
  0x41   : > { %1304 = vmatpush1.bf16.msra.mxu0 %v1303_v15 }
  0x42   : > { %1306 = vmatprep.subr.bf16.mxu0 %v1305_v16 }
  0x43   : > { %1332 = vmatpush1.bf16.msra.mxu1 %v1331_v59 }
  0x44   : > { %1334 = vmatprep.subr.bf16.mxu1 %v1333_v62 }
  0x45   : > { %1308 = vmatpush1.bf16.msra.mxu0 %v1307_v21  ;;  %v751_v21 = vstv %s1211_s12 }
  0x46   : > { %1310 = vmatprep.subr.bf16.mxu0 %v1309_v22  ;;  %v1953_v22 = vsub.s32 1, %v749_v20  ;;  %v752_v23 = vadd.s32 %v751_v21, %v749_v20 }
  0x47   : > { %1336 = vmatpush1.bf16.msra.mxu1 %v1335_v1 }
  0x48   : > { %1338 = vmatprep.subr.bf16.mxu1 %v1337_v4  ;;  %vm766_vm0 = vcmp.lt.s32.totalorder %v752_v23, 2  ;;  %vm788_vm1 = vcmp.ge.s32.totalorder %v752_v23, 30  ;;  %v775_v51 = vrot.slane %v402_v41, %v1953_v22 }
  0x49   : > { %1312 = vmatpush1.bf16.msra.mxu0 %v1311_v25  ;;  %v403_v25 = vld [vmem:[%s375_s11 + $0x8] sm:$0xff] }
  0x4a   : > { %v779_v28 = vrot.slane %v403_v25, %v1953_v22  ;;  %v761_v30 = vrot.slane %v403_v25, %v1955_v24  ;;  %v780_v57 = vsel %vm766_vm0, %v775_v51, 0.0 }
  0x4b   : > { %1340 = vmatpush1.bf16.msra.mxu1 %v1339_v8 }
  0x4c   : > { %731 = vmatmul.mubr.f32.vlgmr.msra.gmra.mrb[0].mxu0 %v412_v26  ;;  %1342 = vmatprep.subr.bf16.mxu1 %v1341_v12  ;;  %v750_v26 = vadd.s32 8, %v749_v20  ;;  %v781_v37 = vsel %vm766_vm0, %v779_v28, 0.0 }
  0x4d   : > { %736 = vmatprep.mubr.f32.mxu0 %v1446_v7 }
  0x4e   : > { %v753_v31 = vadd.s32 %v751_v21, %v750_v26 }
  0x4f   : > { %1344 = vmatpush1.bf16.msra.mxu1 %v1343_v14 }
  0x50   : > { %737 = vmatmul.mubr.f32.gmra.mrb[2].mxu0 %v413_v27  ;;  %v796_v27 = vsub.s32 2, %v749_v20  ;;  %vm767_vm2 = vcmp.lt.s32.totalorder %v753_v31, 2  ;;  %vm789_vm3 = vcmp.ge.s32.totalorder %v753_v31, 30 }
  0x51   : > { %v783_v47 = vsel %vm767_vm2, %v779_v28, 0.0  ;;  %v782_v63 = vsel %vm767_vm2, %v775_v51, 0.0 }
  0x52   : > { %v801_v34 = vrot.slane %v403_v25, %v796_v27  ;;  %v797_v58 = vrot.slane %v402_v41, %v796_v27 }
  0x54   : > { %v803_v42 = vsel %vm788_vm1, %v801_v34, 0.0  ;;  %v805_v52 = vsel %vm789_vm3, %v801_v34, 0.0  ;;  %v802_v62 = vsel %vm788_vm1, %v797_v58, 0.0  ;;  %v804_v2 = vsel %vm789_vm3, %v797_v58, 0.0 }
 0x105   : > { %v545_v15 = vpop.f32.mrb[0].mxu1 }
 0x106   : > { %v547_v16 = vpop.f32.mrb[1].mxu1 }
 0x109   : > { %v551_v17 = vpop.f32.mrb[2].mxu1 }
 0x10a   : > { %v553_v18 = vpop.f32.mrb[3].mxu1 }
 0x11f   : > { %v732_v29 = vpop.f32.mrb[0].mxu0 }
 0x120   : > { %v1345_v32 = vadd.f32 %v732_v29, %v545_v15  ;;  %v734_v33 = vpop.f32.mrb[1].mxu0  ;;  %v858_v15 = vld [vmem:[%s2005_s5] sm:$0x3] }
 0x121   : > { %v1346_v36 = vadd.f32 %v734_v33, %v547_v16  ;;  %v863_v16 = vrot.slane %v858_v15, %v1955_v24 }
 0x122   : > { %v762_v55 = vadd.f32 %v1345_v32, %v757_v48 }
 0x123   : > { %v763_v38 = vadd.f32 %v1346_v36, %v761_v30  ;;  %v738_v39 = vpop.f32.mrb[2].mxu0 }
 0x124   : > { %v1347_v43 = vadd.f32 %v738_v39, %v551_v17  ;;  %v740_v44 = vpop.f32.mrb[3].mxu0  ;;  %v784_v60 = vsub.f32 %v762_v55, %v780_v57  ;;  %v867_v17 = vrot.slane %v858_v15, %v1953_v22 }
 0x125   : > { %v785_v45 = vsub.f32 %v763_v38, %v781_v37  ;;  %v1348_v46 = vadd.f32 %v740_v44, %v553_v18 }
 0x126   : > { %v764_v61 = vadd.f32 %v1347_v43, %v757_v48  ;;  %v806_v0 = vsub.f32 %v784_v60, %v802_v62 }
 0x127   : > { %v807_v49 = vsub.f32 %v785_v45, %v803_v42  ;;  %v765_v50 = vadd.f32 %v1348_v46, %v761_v30 }
 0x128   : > { %v786_v1 = vsub.f32 %v764_v61, %v782_v63 }
 0x129   : > { %v1212_v53 = vmul.f32 -1.442695, %v807_v49  ;;  %v787_v54 = vsub.f32 %v765_v50, %v783_v47 }
 0x12a   : > { %v808_v5 = vsub.f32 %v786_v1, %v804_v2 }
 0x12b   : > { %1394 = vpow2.f32 %v1212_v53  ;;  %v809_v56 = vsub.f32 %v787_v54, %v805_v52 }
 0x12d   : > { %v1213_v59 = vmul.f32 -1.442695, %v809_v56 }
 0x12f   : > { %1396 = vpow2.f32 %v1213_v59 }
 0x130   : > { %1398 = vtanh.f32 %v806_v0 }
 0x135   : > { %v1395_v3 = vpop.eup %1394 }
 0x136   : > { %v818_v4 = vadd.f32 1.0, %v1395_v3 }
 0x138   : > { %1400 = vrcp.f32 %v818_v4 }
 0x139   : > { %v1397_v6 = vpop.eup %1396  ;;  %1402 = vtanh.f32 %v808_v5 }
 0x13a   : > { %v819_v8 = vadd.f32 1.0, %v1397_v6  ;;  %v1399_v9 = vpop.eup %1398 }
 0x13c   : > { %1404 = vrcp.f32 %v819_v8 }
 0x142   : > { %v1401_v10 = vpop.eup %1400 }
 0x143   : > { %v824_v11 = vmul.f32 %v1401_v10, %v1399_v9  ;;  %v1403_v12 = vpop.eup %1402 }
 0x145   : > { %935 = vmatmul.mubr.f32.vlgmr.msra.gmra.mrb[4].mxu1 %v824_v11 }
 0x146   : > { %v1405_v13 = vpop.eup %1404  ;;  %940 = vmatprep.mubr.f32.mxu1 %v1446_v7 }
 0x147   : > { %v825_v14 = vmul.f32 %v1405_v13, %v1403_v12 }
 0x149   : > { %941 = vmatmul.mubr.f32.gmra.mrb[6].mxu1 %v825_v14 }
 0x218   : > { %v936_v18 = vpop.f32.mrb[4].mxu1 }
 0x219   : > { %v937_v19 = vadd.f32 %v936_v18, %v863_v16  ;;  %v938_v20 = vpop.f32.mrb[5].mxu1 }
 0x21a   : > { %v939_v21 = vadd.f32 %v938_v20, %v867_v17 }
 0x21b   : > { %v947_v7 = vadd.f32 %v937_v19, %v1615_v35 }
 0x21c   : > { %953 = vst [vmem:[%s394_s15] sm:$0xff] %v939_v21  ;;  %v942_v23 = vpop.f32.mrb[6].mxu1 }
 0x21d   : > { %v949_v25 = vmul.f32 0.70710677, %v947_v7  ;;  %v943_v24 = vadd.f32 %v942_v23, %v863_v16  ;;  %v944_v26 = vpop.f32.mrb[7].mxu1 }
 0x21e   : > { %v945_v22 = vadd.f32 %v944_v26, %v867_v17 }
 0x21f   : > { %951 = vst [vmem:[%s384_s20] sm:$0xff] %v949_v25  ;;  %v948_v27 = vadd.f32 %v943_v24, %v1754_v40 }
 0x220   : > { %954 = vst [vmem:[%s394_s15 + $0x8] sm:$0xff] %v945_v22 }
 0x221   : > { %v950_v28 = vmul.f32 0.70710677, %v948_v27 }
 0x223   : > { %952 = vst [vmem:[%s384_s20 + $0x8] sm:$0xff] %v950_v28 }
 0x224 PF: > { %s18_s28 = sadd.s32 1, %s1444_s28   ;;  %s2008_s24 = smov %s1436_s26 }
 0x225   : > { %p15_p8 = scmp.ge.s32.totalorder %s18_s28, 6   ;;  %s2009_s25 = smov %s1440_s27 }
 0x226   : > { %s2010_s26 = smov %s2013_s29  ;;  %s2011_s27 = smov %s2017_s30 }
 0x227   :  { %17 = sbr.rel (!%p15_p8) target bundleno = 3 (0x3), region = 94 }

</bundles_post_ra>
